<compile_context>
chip_gen: v5e
topology: v5e:2x2
jax: 0.10.0
libtpu: 0.0.40
codegen_flags: <defaults>
</compile_context>

<pallas_src>
import functools
import math

import jax
import jax.numpy as jnp
from jax.experimental import pallas as pl
from jax.experimental.pallas import tpu as pltpu


def _round_up(v: int, m: int) -> int:
    return (v + m - 1) // m * m


def _embed_kernel(x_ref, w_ref, b_ref, o_ref, *, scale):
    # x_ref: (TM, K)   w_ref: (K, N)   b_ref: (1, N)   o_ref: (TM, N)
    acc = jnp.dot(x_ref[...], w_ref[...], preferred_element_type=jnp.float32)
    acc = acc + b_ref[...].astype(jnp.float32)      # broadcast (1, N) over rows
    o_ref[...] = (acc * scale).astype(o_ref.dtype)


def input_embeddings(x, weight, bias, d_model, *, tm=512):
    """x: (..., input_size); weight: (d_model, input_size); bias: (d_model,) or None."""
    orig_shape = x.shape
    k = orig_shape[-1]
    n = d_model

    x2 = x.reshape(-1, k)                            # (M, K)
    m = x2.shape[0]
    dtype = x2.dtype
    itemsize = jnp.dtype(dtype).itemsize

    if bias is None:
        bias = jnp.zeros((n,), dtype=dtype)

    # Lane alignment (no-op for typical model dims).
    k_pad = _round_up(k, 128)
    n_pad = _round_up(n, 128)

    # One-time transpose so the contraction dim (K) is the RHS leading dim in-kernel.
    w_t = weight.astype(dtype).T                     # (K, N)
    if k_pad != k or n_pad != n:
        w_t = jnp.pad(w_t, ((0, k_pad - k), (0, n_pad - n)))
    if k_pad != k:
        x2 = jnp.pad(x2, ((0, 0), (0, k_pad - k)))
    b2 = bias if n_pad == n else jnp.pad(bias, (0, n_pad - n))
    b2 = b2.reshape(1, n_pad)

    # --- tile sizing / VMEM budget --------------------------------------------------
    try:
        vmem_cap = int(pltpu.get_tpu_info().vmem_capacity_bytes)
    except Exception:
        vmem_cap = 64 * 1024 * 1024                  # conservative (v7x per-core)
    budget = int(vmem_cap * 0.6)

    tm = max(8, min(_round_up(tm, 8), _round_up(m, 8)))

    def _vmem_bytes(t):
        streamed = 2 * t * (k_pad + n_pad) * itemsize      # x + out tiles, double-buffered
        resident = (k_pad * n_pad + n_pad) * itemsize      # weight + bias, single-buffered
        return streamed + resident

    while tm > 64 and _vmem_bytes(tm) > budget:
        tm //= 2
    # TODO(synk): for very large d_model*input_size the resident weight alone can exceed the
    # VMEM budget; add N (and a K-accumulator) grid axes instead of holding it whole.

    grid = (pl.cdiv(m, tm),)                         # ragged last block handled by Pallas
    scale = float(math.sqrt(d_model))

    cost = pl.CostEstimate(
        flops=2 * m * k * n,
        transcendentals=0,
        bytes_accessed=itemsize * (m * k + k * n + m * n + n),
    )
    compiler_params = pltpu.CompilerParams(
        dimension_semantics=("parallel",),           # megacore-shardable on v7x
        vmem_limit_bytes=int(vmem_cap * 0.8),        # v5e default scoped limit is only 16 MiB
    )
    kernel = functools.partial(_embed_kernel, scale=scale)

    def _run(single_buffer_params):
        extra = {"pipeline_mode": pl.Buffered(1)} if single_buffer_params else {}
        return pl.pallas_call(
            kernel,
            out_shape=jax.ShapeDtypeStruct((m, n_pad), dtype),
            grid_spec=pltpu.PrefetchScalarGridSpec(
                num_scalar_prefetch=0,
                grid=grid,
                in_specs=[
                    pl.BlockSpec((tm, k_pad), lambda i: (i, 0)),               # x streams over M
                    pl.BlockSpec((k_pad, n_pad), lambda i: (0, 0), **extra),   # resident weight
                    pl.BlockSpec((1, n_pad), lambda i: (0, 0), **extra),       # resident bias
                ],
                out_specs=pl.BlockSpec((tm, n_pad), lambda i: (i, 0)),
            ),
            compiler_params=compiler_params,
            cost_estimate=cost,
        )(x2, w_t, b2)

    try:
        out = _run(True)       # weight/bias single-buffered (halves resident VMEM)
    except Exception:
        out = _run(False)      # fallback if pipeline_mode=pl.Buffered(1) is unsupported

    if n_pad != n:
        out = out[:, :n]
    return out.reshape(*orig_shape[:-1], n)


if __name__ == "__main__":
    d_model = 32
    input_size = 16
    batch, seq = 2, 8

    key = jax.random.PRNGKey(0)
    kx, kw, kb = jax.random.split(key, 3)

    # Deterministic synthetic parameters (same shapes as nn.Linear(input_size, d_model)).
    bound = 1.0 / math.sqrt(input_size)
    weight = jax.random.uniform(kw, (d_model, input_size), jnp.float32, -bound, bound)
    bias = jax.random.uniform(kb, (d_model,), jnp.float32, -bound, bound)

    x = jax.random.normal(kx, (batch, seq, input_size), jnp.float32)

    out = jax.block_until_ready(input_embeddings(x, weight, bias, d_model))

    # Reference check (plain JAX) to verify semantics.
    ref = (x @ weight.T + bias) * math.sqrt(d_model)
    assert out.shape == (batch, seq, d_model)
    assert jnp.allclose(out, ref, atol=1e-4, rtol=1e-4)

    print("KERNEL_OK")
</pallas_src>

<mosaic_0001>
module attributes {stable_mosaic.version = 11 : i64} {
  func.func @_embed_kernel(%arg0: i32, %arg1: memref<16x128xf32, #tpu.memory_space<vmem>>, %arg2: memref<128x128xf32, #tpu.memory_space<vmem>>, %arg3: memref<1x128xf32, #tpu.memory_space<vmem>>, %arg4: memref<16x128xf32, #tpu.memory_space<vmem>>) attributes {dimension_semantics = [#tpu.dimension_semantics<parallel>], iteration_bounds = array<i64: 1>, scalar_prefetch = 0 : i64, scratch_operands = 0 : i64, tpu.core_type = #tpu.core_type<tc>, window_params = [{transform_indices = @transform_0, window_bounds = array<i64: 16, 128>}, {pipeline_mode = #tpu.pipeline_mode<synchronous>, transform_indices = @transform_1, window_bounds = array<i64: 128, 128>}, {pipeline_mode = #tpu.pipeline_mode<synchronous>, transform_indices = @transform_2, window_bounds = array<i64: 1, 128>}, {transform_indices = @transform_3, window_bounds = array<i64: 16, 128>}]} {
    %c0 = arith.constant 0 : index
    %c0_0 = arith.constant 0 : index
    %0 = vector.load %arg1[%c0, %c0_0] : memref<16x128xf32, #tpu.memory_space<vmem>>, vector<16x128xf32>
    %c0_1 = arith.constant 0 : index
    %c0_2 = arith.constant 0 : index
    %1 = vector.load %arg2[%c0_1, %c0_2] : memref<128x128xf32, #tpu.memory_space<vmem>>, vector<128x128xf32>
    %cst = arith.constant dense<0.000000e+00> : vector<16x128xf32>
    %2 = tpu.matmul %0, %1, %cst {dimension_numbers = #tpu.dot_dimension_numbers<[1], [0], [0], [1], [0, 0, 1, 1], [], []>} : vector<16x128xf32>, vector<128x128xf32>, vector<16x128xf32> -> vector<16x128xf32>
    %c0_3 = arith.constant 0 : index
    %c0_4 = arith.constant 0 : index
    %3 = vector.load %arg3[%c0_3, %c0_4] : memref<1x128xf32, #tpu.memory_space<vmem>>, vector<1x128xf32>
    %4 = vector.broadcast %3 : vector<1x128xf32> to vector<16x128xf32>
    %5 = arith.addf %2, %4 : vector<16x128xf32>
    %cst_5 = arith.constant 5.65685415 : f32
    %6 = vector.broadcast %cst_5 : f32 to vector<16x128xf32>
    %7 = arith.mulf %5, %6 : vector<16x128xf32>
    %c0_6 = arith.constant 0 : index
    %c0_7 = arith.constant 0 : index
    %8 = vector.load %arg4[%c0_6, %c0_7] : memref<16x128xf32, #tpu.memory_space<vmem>>, vector<16x128xf32>
    tpu.vector_store %arg4[%c0_6, %c0_7], %7 {strides = array<i32>} : memref<16x128xf32, #tpu.memory_space<vmem>>, vector<16x128xf32>,
    return
  }
  func.func @transform_0(%arg0: i32) -> (i32, i32) {
    %c0_i32 = arith.constant 0 : i32
    %c0_i32_0 = arith.constant 0 : i32
    return %arg0, %c0_i32 : i32, i32
  }
  func.func @transform_1(%arg0: i32) -> (i32, i32) {
    %c0_i32 = arith.constant 0 : i32
    %c0_i32_0 = arith.constant 0 : i32
    %c0_i32_1 = arith.constant 0 : i32
    return %c0_i32, %c0_i32_0 : i32, i32
  }
  func.func @transform_2(%arg0: i32) -> (i32, i32) {
    %c0_i32 = arith.constant 0 : i32
    %c0_i32_0 = arith.constant 0 : i32
    %c0_i32_1 = arith.constant 0 : i32
    return %c0_i32, %c0_i32_0 : i32, i32
  }
  func.func @transform_3(%arg0: i32) -> (i32, i32) {
    %c0_i32 = arith.constant 0 : i32
    %c0_i32_0 = arith.constant 0 : i32
    return %arg0, %c0_i32 : i32, i32
  }
}

module attributes {stable_mosaic.version = 11 : i64} {
  func.func @_embed_kernel(%arg0: i32, %arg1: memref<16x128xf32, #tpu.memory_space<vmem>>, %arg2: memref<128x128xf32, #tpu.memory_space<vmem>>, %arg3: memref<1x128xf32, #tpu.memory_space<vmem>>, %arg4: memref<16x128xf32, #tpu.memory_space<vmem>>) attributes {dimension_semantics = [#tpu.dimension_semantics<parallel>], iteration_bounds = array<i64: 1>, scalar_prefetch = 0 : i64, scratch_operands = 0 : i64, tpu.core_type = #tpu.core_type<tc>, window_params = [{transform_indices = @transform_0, window_bounds = array<i64: 16, 128>}, {pipeline_mode = #tpu.pipeline_mode<synchronous>, transform_indices = @transform_1, window_bounds = array<i64: 128, 128>}, {pipeline_mode = #tpu.pipeline_mode<synchronous>, transform_indices = @transform_2, window_bounds = array<i64: 1, 128>}, {transform_indices = @transform_3, window_bounds = array<i64: 16, 128>}]} {
    %c0 = arith.constant 0 : index
    %c0_0 = arith.constant 0 : index
    %0 = vector.load %arg1[%c0, %c0_0] : memref<16x128xf32, #tpu.memory_space<vmem>>, vector<16x128xf32>
    %c0_1 = arith.constant 0 : index
    %c0_2 = arith.constant 0 : index
    %1 = vector.load %arg2[%c0_1, %c0_2] : memref<128x128xf32, #tpu.memory_space<vmem>>, vector<128x128xf32>
    %cst = arith.constant dense<0.000000e+00> : vector<16x128xf32>
    %2 = tpu.matmul %0, %1, %cst {dimension_numbers = #tpu.dot_dimension_numbers<[1], [0], [0], [1], [0, 0, 1, 1], [], []>} : vector<16x128xf32>, vector<128x128xf32>, vector<16x128xf32> -> vector<16x128xf32>
    %c0_3 = arith.constant 0 : index
    %c0_4 = arith.constant 0 : index
    %3 = vector.load %arg3[%c0_3, %c0_4] : memref<1x128xf32, #tpu.memory_space<vmem>>, vector<1x128xf32>
    %4 = vector.broadcast %3 : vector<1x128xf32> to vector<16x128xf32>
    %5 = arith.addf %2, %4 : vector<16x128xf32>
    %cst_5 = arith.constant 5.65685415 : f32
    %6 = vector.broadcast %cst_5 : f32 to vector<16x128xf32>
    %7 = arith.mulf %5, %6 : vector<16x128xf32>
    %c0_6 = arith.constant 0 : index
    %c0_7 = arith.constant 0 : index
    %8 = vector.load %arg4[%c0_6, %c0_7] : memref<16x128xf32, #tpu.memory_space<vmem>>, vector<16x128xf32>
    tpu.vector_store %arg4[%c0_6, %c0_7], %7 {strides = array<i32>} : memref<16x128xf32, #tpu.memory_space<vmem>>, vector<16x128xf32>,
    return
  }
  func.func @transform_0(%arg0: i32) -> (i32, i32) {
    %c0_i32 = arith.constant 0 : i32
    %c0_i32_0 = arith.constant 0 : i32
    return %arg0, %c0_i32 : i32, i32
  }
  func.func @transform_1(%arg0: i32) -> (i32, i32) {
    %c0_i32 = arith.constant 0 : i32
    %c0_i32_0 = arith.constant 0 : i32
    %c0_i32_1 = arith.constant 0 : i32
    return %c0_i32, %c0_i32_0 : i32, i32
  }
  func.func @transform_2(%arg0: i32) -> (i32, i32) {
    %c0_i32 = arith.constant 0 : i32
    %c0_i32_0 = arith.constant 0 : i32
    %c0_i32_1 = arith.constant 0 : i32
    return %c0_i32, %c0_i32_0 : i32, i32
  }
  func.func @transform_3(%arg0: i32) -> (i32, i32) {
    %c0_i32 = arith.constant 0 : i32
    %c0_i32_0 = arith.constant 0 : i32
    return %arg0, %c0_i32 : i32, i32
  }
}

</mosaic_0001>

<bundles_post_ra>
// kernel: tpu_custom_call.1
= control target key start
LH: loop header
LB: loop body
LE: loop exit
PB: predicated region body
PF: predicated region fallthrough
CT: control target
= control target key end

     0   :  { %8 = vsyncpa [#allocation3], 0  ;;  %s262_s0 = inlined_call_operand.hbm [shape: f32[16,128], index: 0, kind: input, shape index: {}]   ;;  %s263_s1 = inlined_call_operand.hbm [shape: f32[128,128], index: 1, kind: input, shape index: {}]   ;;  %s264_s2 = inlined_call_operand.vmem [shape: f32[1,128], index: 2, kind: input, shape index: {}]   ;;  %s265_s3 = inlined_call_operand.hbm [shape: f32[16,128], index: 3, kind: output, shape index: {}]  }
   0x1   :  { %9 = vsyncpa [#allocation6], 0 }
   0x2   :  { %10 = vsyncpa [#allocation4], 0  ;;  %s15_s14 = sshll.u32 %s262_s0, 4  ;;  %s216_s15 = smov [#allocation2]   ;;  %s16_s14 = int_to_ptr.hbm [resolvable:$true] %s15_s14 }
   0x3   :  { %s17_s16 = sshll.u32 %s216_s15, 4  ;;  %s28_s19 = sshll.u32 %s263_s1, 4  ;;  %s18_s16 = int_to_ptr.vmem [resolvable:$true] %s17_s16  ;;  %s29_s19 = int_to_ptr.hbm [resolvable:$true] %s28_s19 }
   0x4   :  { %s217_s20 = smov 128   ;;  %s218_s21 = smov 8  }
   0x5   :  { %23 = dma.hbm_to_vmem [thread:$0]  %s16_s14, 256, %s18_s16, [#allocation3], %s217_s20, %s217_s20, %s218_s21  }
   0x6   :  { %s219_s22 = smov [#allocation5]  }
   0x7   :  { %s30_s23 = sshll.u32 %s219_s22, 4  ;;  %s31_s23 = int_to_ptr.vmem [resolvable:$true] %s30_s23 }
   0x8   :  { %36 = dma.hbm_to_vmem [thread:$0]  %s29_s19, 2048, %s31_s23, [#allocation6], %s217_s20, %s217_s20, %s218_s21  }
   0x9   :  { %210 = dma.done.wait [#allocation3], 256  }
   0xa   :  { %211 = vsyncadd [#allocation3], 4294967040 }
   0xb   :  { %212 = dma.done.wait [#allocation6], 2048  }
   0xc   :  { %213 = vsyncadd [#allocation6], 4294965248  ;;  %v64_v0 = vld [vmem:[#allocation5 + $0x78] sm:$0xff]  ;;  %v63_v1 = vld [vmem:[#allocation5 + $0x70] sm:$0xff]  ;;  %s220_s24 = smov [#allocation7]   ;;  %s102_s28 = sshll.u32 %s265_s3, 4  ;;  %s103_s28 = int_to_ptr.hbm [resolvable:$true] %s102_s28 }
   0xd   :  { %69 = vmatpush.msra.mxu0 %v64_v0  ;;  %116 = vmatpush.msra.mxu1 %v64_v0  ;;  %v62_v2 = vld [vmem:[#allocation5 + $0x68] sm:$0xff]  ;;  %v61_v3 = vld [vmem:[#allocation5 + $0x60] sm:$0xff]  ;;  %v60_v4 = vld [vmem:[#allocation5 + $0x58] sm:$0xff]  ;;  %s100_s25 = sshll.u32 %s220_s24, 4  ;;  %s101_s25 = int_to_ptr.vmem [resolvable:$true] %s100_s25 }
   0xe   :  { %v59_v5 = vld [vmem:[#allocation5 + $0x50] sm:$0xff]  ;;  %v58_v6 = vld [vmem:[#allocation5 + $0x48] sm:$0xff]  ;;  %v57_v7 = vld [vmem:[#allocation5 + $0x40] sm:$0xff] }
   0xf   :  { %70 = vmatpush.msra.mxu0 %v63_v1  ;;  %117 = vmatpush.msra.mxu1 %v63_v1  ;;  %v56_v8 = vld [vmem:[#allocation5 + $0x38] sm:$0xff]  ;;  %v55_v9 = vld [vmem:[#allocation5 + $0x30] sm:$0xff]  ;;  %v54_v10 = vld [vmem:[#allocation5 + $0x28] sm:$0xff] }
  0x10   :  { %v53_v11 = vld [vmem:[#allocation5 + $0x20] sm:$0xff]  ;;  %v52_v12 = vld [vmem:[#allocation5 + $0x18] sm:$0xff]  ;;  %v51_v13 = vld [vmem:[#allocation5 + $0x10] sm:$0xff] }
  0x11   :  { %71 = vmatpush.msra.mxu0 %v62_v2  ;;  %118 = vmatpush.msra.mxu1 %v62_v2  ;;  %v50_v14 = vld [vmem:[#allocation5 + $0x8] sm:$0xff]  ;;  %v49_v15 = vld [vmem:[#allocation5] sm:$0xff]  ;;  %v47_v16 = vld [vmem:[#allocation2] sm:$0xff] }
  0x12   :  { %v48_v17 = vld [vmem:[#allocation2 + $0x8] sm:$0xff]  ;;  %v137_v18 = vld [vmem:[%s264_s2] ss:$0 sm:$0xff] }
  0x13   :  { %72 = vmatpush.msra.mxu0 %v61_v3  ;;  %119 = vmatpush.msra.mxu1 %v61_v3 }
  0x15   :  { %73 = vmatpush.msra.mxu0 %v60_v4  ;;  %120 = vmatpush.msra.mxu1 %v60_v4 }
  0x17   :  { %74 = vmatpush.msra.mxu0 %v59_v5  ;;  %121 = vmatpush.msra.mxu1 %v59_v5 }
  0x19   :  { %75 = vmatpush.msra.mxu0 %v58_v6  ;;  %122 = vmatpush.msra.mxu1 %v58_v6 }
  0x1b   :  { %76 = vmatpush.msra.mxu0 %v57_v7  ;;  %123 = vmatpush.msra.mxu1 %v57_v7 }
  0x1d   :  { %77 = vmatpush.msra.mxu0 %v56_v8  ;;  %124 = vmatpush.msra.mxu1 %v56_v8 }
  0x1f   :  { %78 = vmatpush.msra.mxu0 %v55_v9  ;;  %125 = vmatpush.msra.mxu1 %v55_v9 }
  0x21   :  { %79 = vmatpush.msra.mxu0 %v54_v10  ;;  %126 = vmatpush.msra.mxu1 %v54_v10 }
  0x23   :  { %80 = vmatpush.msra.mxu0 %v53_v11  ;;  %127 = vmatpush.msra.mxu1 %v53_v11 }
  0x25   :  { %81 = vmatpush.msra.mxu0 %v52_v12  ;;  %128 = vmatpush.msra.mxu1 %v52_v12 }
  0x27   :  { %82 = vmatpush.msra.mxu0 %v51_v13  ;;  %129 = vmatpush.msra.mxu1 %v51_v13 }
  0x29   :  { %83 = vmatpush.msra.mxu0 %v50_v14  ;;  %130 = vmatpush.msra.mxu1 %v50_v14 }
  0x2b   :  { %84 = vmatpush.msra.mxu0 %v49_v15  ;;  %131 = vmatpush.msra.mxu1 %v49_v15 }
  0x2c   :  { %85 = vmatmul.f32.vlgmr.msra.gmra.mxu0 %v47_v16  ;;  %88 = vmatmul.f32.vlgmr.msra.gmra.mxu1 %v48_v17 }
  0xa9   :  { %v86_v19 = vpop.f32.mrf.mxu0  ;;  %v89_v20 = vpop.f32.mrf.mxu1 }
  0xaa   :  { %v87_v21 = vadd.f32 %v137_v18, %v86_v19  ;;  %v90_v22 = vadd.f32 %v137_v18, %v89_v20 }
  0xac   :  { %v92_v23 = vmul.f32 5.656854, %v87_v21  ;;  %v93_v24 = vmul.f32 5.656854, %v90_v22 }
  0xae   :  { %94 = vst [vmem:[#allocation7] sm:$0xff] %v92_v23 }
  0xaf   :  { %95 = vst [vmem:[#allocation7 + $0x8] sm:$0xff] %v93_v24 }
  0xb0   :  { %108 = dma.vmem_to_hbm [thread:$0]  %s101_s25, 256, %s103_s28, [#allocation4], %s217_s20, %s217_s20, %s218_s21  }
  0xb1   :  { %214 = dma.done.wait [#allocation4], 256  }
  0xb2   :  { %215 = vsyncadd [#allocation4], 4294967040 }
  0xb3   :  { %113 = vsyncpa [#allocation3], 1 }
  0xb4   :  { %114 = vsyncpa [#allocation6], 1 }
  0xb5   :  { %115 = vsyncpa [#allocation4], 1 }

// kernel: tpu_custom_call.1
= control target key start
LH: loop header
LB: loop body
LE: loop exit
PB: predicated region body
PF: predicated region fallthrough
CT: control target
= control target key end

     0   :  { %8 = vsyncpa [#allocation3], 0  ;;  %s262_s0 = inlined_call_operand.hbm [shape: f32[16,128], index: 0, kind: input, shape index: {}]   ;;  %s263_s1 = inlined_call_operand.hbm [shape: f32[128,128], index: 1, kind: input, shape index: {}]   ;;  %s264_s2 = inlined_call_operand.vmem [shape: f32[1,128], index: 2, kind: input, shape index: {}]   ;;  %s265_s3 = inlined_call_operand.hbm [shape: f32[16,128], index: 3, kind: output, shape index: {}]  }
   0x1   :  { %9 = vsyncpa [#allocation6], 0 }
   0x2   :  { %10 = vsyncpa [#allocation4], 0  ;;  %s15_s14 = sshll.u32 %s262_s0, 4  ;;  %s216_s15 = smov [#allocation2]   ;;  %s16_s14 = int_to_ptr.hbm [resolvable:$true] %s15_s14 }
   0x3   :  { %s17_s16 = sshll.u32 %s216_s15, 4  ;;  %s28_s19 = sshll.u32 %s263_s1, 4  ;;  %s18_s16 = int_to_ptr.vmem [resolvable:$true] %s17_s16  ;;  %s29_s19 = int_to_ptr.hbm [resolvable:$true] %s28_s19 }
   0x4   :  { %s217_s20 = smov 128   ;;  %s218_s21 = smov 8  }
   0x5   :  { %23 = dma.hbm_to_vmem [thread:$0]  %s16_s14, 256, %s18_s16, [#allocation3], %s217_s20, %s217_s20, %s218_s21  }
   0x6   :  { %s219_s22 = smov [#allocation5]  }
   0x7   :  { %s30_s23 = sshll.u32 %s219_s22, 4  ;;  %s31_s23 = int_to_ptr.vmem [resolvable:$true] %s30_s23 }
   0x8   :  { %36 = dma.hbm_to_vmem [thread:$0]  %s29_s19, 2048, %s31_s23, [#allocation6], %s217_s20, %s217_s20, %s218_s21  }
   0x9   :  { %210 = dma.done.wait [#allocation3], 256  }
   0xa   :  { %211 = vsyncadd [#allocation3], 4294967040 }
   0xb   :  { %212 = dma.done.wait [#allocation6], 2048  }
   0xc   :  { %213 = vsyncadd [#allocation6], 4294965248  ;;  %v64_v0 = vld [vmem:[#allocation5 + $0x78] sm:$0xff]  ;;  %v63_v1 = vld [vmem:[#allocation5 + $0x70] sm:$0xff]  ;;  %s220_s24 = smov [#allocation7]   ;;  %s102_s28 = sshll.u32 %s265_s3, 4  ;;  %s103_s28 = int_to_ptr.hbm [resolvable:$true] %s102_s28 }
   0xd   :  { %69 = vmatpush.msra.mxu0 %v64_v0  ;;  %116 = vmatpush.msra.mxu1 %v64_v0  ;;  %v62_v2 = vld [vmem:[#allocation5 + $0x68] sm:$0xff]  ;;  %v61_v3 = vld [vmem:[#allocation5 + $0x60] sm:$0xff]  ;;  %v60_v4 = vld [vmem:[#allocation5 + $0x58] sm:$0xff]  ;;  %s100_s25 = sshll.u32 %s220_s24, 4  ;;  %s101_s25 = int_to_ptr.vmem [resolvable:$true] %s100_s25 }
   0xe   :  { %v59_v5 = vld [vmem:[#allocation5 + $0x50] sm:$0xff]  ;;  %v58_v6 = vld [vmem:[#allocation5 + $0x48] sm:$0xff]  ;;  %v57_v7 = vld [vmem:[#allocation5 + $0x40] sm:$0xff] }
   0xf   :  { %70 = vmatpush.msra.mxu0 %v63_v1  ;;  %117 = vmatpush.msra.mxu1 %v63_v1  ;;  %v56_v8 = vld [vmem:[#allocation5 + $0x38] sm:$0xff]  ;;  %v55_v9 = vld [vmem:[#allocation5 + $0x30] sm:$0xff]  ;;  %v54_v10 = vld [vmem:[#allocation5 + $0x28] sm:$0xff] }
  0x10   :  { %v53_v11 = vld [vmem:[#allocation5 + $0x20] sm:$0xff]  ;;  %v52_v12 = vld [vmem:[#allocation5 + $0x18] sm:$0xff]  ;;  %v51_v13 = vld [vmem:[#allocation5 + $0x10] sm:$0xff] }
  0x11   :  { %71 = vmatpush.msra.mxu0 %v62_v2  ;;  %118 = vmatpush.msra.mxu1 %v62_v2  ;;  %v50_v14 = vld [vmem:[#allocation5 + $0x8] sm:$0xff]  ;;  %v49_v15 = vld [vmem:[#allocation5] sm:$0xff]  ;;  %v47_v16 = vld [vmem:[#allocation2] sm:$0xff] }
  0x12   :  { %v48_v17 = vld [vmem:[#allocation2 + $0x8] sm:$0xff]  ;;  %v137_v18 = vld [vmem:[%s264_s2] ss:$0 sm:$0xff] }
  0x13   :  { %72 = vmatpush.msra.mxu0 %v61_v3  ;;  %119 = vmatpush.msra.mxu1 %v61_v3 }
  0x15   :  { %73 = vmatpush.msra.mxu0 %v60_v4  ;;  %120 = vmatpush.msra.mxu1 %v60_v4 }
  0x17   :  { %74 = vmatpush.msra.mxu0 %v59_v5  ;;  %121 = vmatpush.msra.mxu1 %v59_v5 }
  0x19   :  { %75 = vmatpush.msra.mxu0 %v58_v6  ;;  %122 = vmatpush.msra.mxu1 %v58_v6 }
  0x1b   :  { %76 = vmatpush.msra.mxu0 %v57_v7  ;;  %123 = vmatpush.msra.mxu1 %v57_v7 }
  0x1d   :  { %77 = vmatpush.msra.mxu0 %v56_v8  ;;  %124 = vmatpush.msra.mxu1 %v56_v8 }
  0x1f   :  { %78 = vmatpush.msra.mxu0 %v55_v9  ;;  %125 = vmatpush.msra.mxu1 %v55_v9 }
  0x21   :  { %79 = vmatpush.msra.mxu0 %v54_v10  ;;  %126 = vmatpush.msra.mxu1 %v54_v10 }
  0x23   :  { %80 = vmatpush.msra.mxu0 %v53_v11  ;;  %127 = vmatpush.msra.mxu1 %v53_v11 }
  0x25   :  { %81 = vmatpush.msra.mxu0 %v52_v12  ;;  %128 = vmatpush.msra.mxu1 %v52_v12 }
  0x27   :  { %82 = vmatpush.msra.mxu0 %v51_v13  ;;  %129 = vmatpush.msra.mxu1 %v51_v13 }
  0x29   :  { %83 = vmatpush.msra.mxu0 %v50_v14  ;;  %130 = vmatpush.msra.mxu1 %v50_v14 }
  0x2b   :  { %84 = vmatpush.msra.mxu0 %v49_v15  ;;  %131 = vmatpush.msra.mxu1 %v49_v15 }
  0x2c   :  { %85 = vmatmul.f32.vlgmr.msra.gmra.mxu0 %v47_v16  ;;  %88 = vmatmul.f32.vlgmr.msra.gmra.mxu1 %v48_v17 }
  0xa9   :  { %v86_v19 = vpop.f32.mrf.mxu0  ;;  %v89_v20 = vpop.f32.mrf.mxu1 }
  0xaa   :  { %v87_v21 = vadd.f32 %v137_v18, %v86_v19  ;;  %v90_v22 = vadd.f32 %v137_v18, %v89_v20 }
  0xac   :  { %v92_v23 = vmul.f32 5.656854, %v87_v21  ;;  %v93_v24 = vmul.f32 5.656854, %v90_v22 }
  0xae   :  { %94 = vst [vmem:[#allocation7] sm:$0xff] %v92_v23 }
  0xaf   :  { %95 = vst [vmem:[#allocation7 + $0x8] sm:$0xff] %v93_v24 }
  0xb0   :  { %108 = dma.vmem_to_hbm [thread:$0]  %s101_s25, 256, %s103_s28, [#allocation4], %s217_s20, %s217_s20, %s218_s21  }
  0xb1   :  { %214 = dma.done.wait [#allocation4], 256  }
  0xb2   :  { %215 = vsyncadd [#allocation4], 4294967040 }
  0xb3   :  { %113 = vsyncpa [#allocation3], 1 }
  0xb4   :  { %114 = vsyncpa [#allocation6], 1 }
  0xb5   :  { %115 = vsyncpa [#allocation4], 1 }

</bundles_post_ra>
